<compile_context>
chip_gen: v7x
topology: tpu7x:2x2x1
jax: 0.10.0
libtpu: 0.0.40
codegen_flags: <defaults>
</compile_context>

<pallas_src>
import jax
import jax.numpy as jnp
from jax.experimental import pallas as pl
from jax.experimental.pallas import tpu as pltpu


def binary_classifier_kernel(x_ref, w1_ref, b1_ref, w2_ref, b2_ref, o_ref):
    o = o_ref.shape[-1]  # number of real output columns

    # fc1 on the MXU, f32 accumulation; bias + ReLU on the VPU.
    h = jnp.dot(x_ref[...], w1_ref[...], preferred_element_type=jnp.float32)
    h = jnp.maximum(h + b1_ref[...], 0.0)

    # Dropout(p=0.3): identity in eval/inference mode.

    # fc2 on the MXU: w2 is lane-padded to 128 in VMEM so this is an aligned
    # MXU tile, but only the first `o` columns are real.
    z_full = jnp.dot(h, w2_ref[...], preferred_element_type=jnp.float32)

    # Slice to the real columns BEFORE bias/sigmoid so the EUP only does
    # TB*O exps (not TB*128) and only O columns are stored back to HBM.
    z = z_full[:, :o] + b2_ref[...]
    o_ref[...] = jax.nn.sigmoid(z).astype(o_ref.dtype)


def prepare_params(w1, b1, w2, b2):
    """One-time parameter prep (hoisted out of the per-call forward path).

    w1: (F, H)  fc1 weight, already transposed vs. PyTorch's (out, in) layout
    b1: (H,)
    w2: (H, O)  fc2 weight, transposed
    b2: (O,)
    """
    H, O = w2.shape
    # Lane-pad w2 to a multiple of 128 so fc2 is an aligned MXU tile. This
    # padding is VMEM-resident only; it never inflates HBM output writeback.
    O_mxu = pl.cdiv(O, 128) * 128
    w2_p = jnp.zeros((H, O_mxu), jnp.float32).at[:, :O].set(w2.astype(jnp.float32))
    return (
        w1.astype(jnp.float32),
        b1.astype(jnp.float32).reshape(1, H),
        w2_p,
        b2.astype(jnp.float32).reshape(1, O),
    )


def binary_classifier_forward(x, params, *, block_batch=4096):
    """Forward pass: sigmoid(relu(x @ w1 + b1) @ w2 + b2).

    x: (B, F) float32; params: output of prepare_params().
    Returns (B, O) float32.
    """
    w1, b1_2d, w2_p, b2_2d = params
    B, F = x.shape
    H = w1.shape[1]
    O = b2_2d.shape[1]
    O_mxu = w2_p.shape[1]

    # Batch tile: multiple of 8 (sublane constraint), capped at block_batch.
    # Big tiles amortize the ~0.35 us per-grid-step overhead and keep the DMA
    # engine streaming.
    TB = min(block_batch, max(8, ((B + 7) // 8) * 8))
    B_pad = pl.cdiv(B, TB) * TB

    x_in = x
    if B_pad != B:
        # Single pad op (only when B is not a multiple of the tile).
        x_in = jnp.zeros((B_pad, F), x.dtype).at[:B].set(x)

    grid = (B_pad // TB,)
    out = pl.pallas_call(
        binary_classifier_kernel,
        out_shape=jax.ShapeDtypeStruct((B_pad, O), jnp.float32),
        grid=grid,
        in_specs=[
            # x tile streams over the batch axis (the only HBM stream at scale).
            pl.BlockSpec((TB, F), lambda i: (i, 0)),
            # Weights / biases: constant block index -> fetched once, then
            # VMEM-resident across the whole grid.
            pl.BlockSpec((F, H), lambda i: (0, 0)),
            pl.BlockSpec((1, H), lambda i: (0, 0)),
            pl.BlockSpec((H, O_mxu), lambda i: (0, 0)),
            pl.BlockSpec((1, O), lambda i: (0, 0)),
        ],
        # Real output width only: writeback is O columns, not a padded slab.
        out_specs=pl.BlockSpec((TB, O), lambda i: (i, 0)),
        compiler_params=pltpu.CompilerParams(
            # Batch tiles are independent -> shard across TCs (v7x megacore).
            dimension_semantics=("parallel",),
        ),
    )(x_in, w1, b1_2d, w2_p, b2_2d)

    if B_pad != B:
        out = out[:B]
    return out


def init_params(key, input_features, hidden_dim, output_dim):
    """Deterministic init matching nn.Linear's U(-1/sqrt(fan_in), 1/sqrt(fan_in))."""
    k1, k2, k3, k4 = jax.random.split(key, 4)
    bound1 = 1.0 / jnp.sqrt(input_features)
    bound2 = 1.0 / jnp.sqrt(hidden_dim)
    # Stored already transposed relative to PyTorch's (out, in) layout.
    w1 = jax.random.uniform(k1, (input_features, hidden_dim), jnp.float32,
                            -bound1, bound1)
    b1 = jax.random.uniform(k2, (hidden_dim,), jnp.float32, -bound1, bound1)
    w2 = jax.random.uniform(k3, (hidden_dim, output_dim), jnp.float32,
                            -bound2, bound2)
    b2 = jax.random.uniform(k4, (output_dim,), jnp.float32, -bound2, bound2)
    return w1, b1, w2, b2


def reference_forward(x, w1, b1, w2, b2):
    h = jnp.maximum(x @ w1 + b1, 0.0)
    z = h @ w2 + b2
    return jax.nn.sigmoid(z)


if __name__ == "__main__":
    # Small shapes consistent with the module's forward: (batch, input_features).
    batch = 8
    input_features = 32
    hidden_dim = 64
    output_dim = 1

    key = jax.random.PRNGKey(0)
    kx, kp = jax.random.split(key)
    x = jax.random.normal(kx, (batch, input_features), jnp.float32)
    w1, b1, w2, b2 = init_params(kp, input_features, hidden_dim, output_dim)

    params = prepare_params(w1, b1, w2, b2)   # one-time per-model prep
    out = binary_classifier_forward(x, params)
    out = jax.block_until_ready(out)

    # Check against a pure-JAX f32 reference. Both paths run their matmuls on
    # the MXU at default precision, so allow a small bf16-pass-level tolerance.
    ref = jax.block_until_ready(reference_forward(x, w1, b1, w2, b2))
    assert out.shape == (batch, output_dim)
    assert jnp.allclose(out, ref, atol=5e-3, rtol=0.0), (
        f"mismatch vs reference: max abs diff = {jnp.max(jnp.abs(out - ref))}")

    print("KERNEL_OK")
</pallas_src>

<mosaic_0001>
module attributes {stable_mosaic.version = 11 : i64} {
  func.func @binary_classifier_kernel(%arg0: i32, %arg1: memref<8x32xf32, #tpu.memory_space<vmem>>, %arg2: memref<32x64xf32, #tpu.memory_space<vmem>>, %arg3: memref<1x64xf32, #tpu.memory_space<vmem>>, %arg4: memref<64x128xf32, #tpu.memory_space<vmem>>, %arg5: memref<1x1xf32, #tpu.memory_space<vmem>>, %arg6: memref<8x1xf32, #tpu.memory_space<vmem>>) attributes {dimension_semantics = [#tpu.dimension_semantics<parallel>], iteration_bounds = array<i64: 1>, scalar_prefetch = 0 : i64, scratch_operands = 0 : i64, tpu.core_type = #tpu.core_type<tc>, window_params = [{transform_indices = @transform_0, window_bounds = array<i64: 8, 32>}, {pipeline_mode = #tpu.pipeline_mode<synchronous>, transform_indices = @transform_1, window_bounds = array<i64: 32, 64>}, {pipeline_mode = #tpu.pipeline_mode<synchronous>, transform_indices = @transform_2, window_bounds = array<i64: 1, 64>}, {pipeline_mode = #tpu.pipeline_mode<synchronous>, transform_indices = @transform_3, window_bounds = array<i64: 64, 128>}, {pipeline_mode = #tpu.pipeline_mode<synchronous>, transform_indices = @transform_4, window_bounds = array<i64: 1, 1>}, {transform_indices = @transform_5, window_bounds = array<i64: 8, 1>}]} {
    %c0 = arith.constant 0 : index
    %c0_0 = arith.constant 0 : index
    %0 = vector.load %arg1[%c0, %c0_0] : memref<8x32xf32, #tpu.memory_space<vmem>>, vector<8x32xf32>
    %c0_1 = arith.constant 0 : index
    %c0_2 = arith.constant 0 : index
    %1 = vector.load %arg2[%c0_1, %c0_2] : memref<32x64xf32, #tpu.memory_space<vmem>>, vector<32x64xf32>
    %cst = arith.constant dense<0.000000e+00> : vector<8x64xf32>
    %2 = tpu.matmul %0, %1, %cst {dimension_numbers = #tpu.dot_dimension_numbers<[1], [0], [0], [1], [0, 0, 1, 1], [], []>} : vector<8x32xf32>, vector<32x64xf32>, vector<8x64xf32> -> vector<8x64xf32>
    %c0_3 = arith.constant 0 : index
    %c0_4 = arith.constant 0 : index
    %3 = vector.load %arg3[%c0_3, %c0_4] : memref<1x64xf32, #tpu.memory_space<vmem>>, vector<1x64xf32>
    %4 = vector.broadcast %3 : vector<1x64xf32> to vector<8x64xf32>
    %5 = arith.addf %2, %4 : vector<8x64xf32>
    %cst_5 = arith.constant 0.000000e+00 : f32
    %6 = vector.broadcast %cst_5 : f32 to vector<8x64xf32>
    %7 = arith.maximumf %5, %6 : vector<8x64xf32>
    %c0_6 = arith.constant 0 : index
    %c0_7 = arith.constant 0 : index
    %8 = vector.load %arg4[%c0_6, %c0_7] : memref<64x128xf32, #tpu.memory_space<vmem>>, vector<64x128xf32>
    %cst_8 = arith.constant dense<0.000000e+00> : vector<8x128xf32>
    %9 = tpu.matmul %7, %8, %cst_8 {dimension_numbers = #tpu.dot_dimension_numbers<[1], [0], [0], [1], [0, 0, 1, 1], [], []>} : vector<8x64xf32>, vector<64x128xf32>, vector<8x128xf32> -> vector<8x128xf32>
    %10 = vector.extract_strided_slice %9 {offsets = [0, 0], sizes = [8, 1], strides = [1, 1]} : vector<8x128xf32> to vector<8x1xf32>
    %c0_9 = arith.constant 0 : index
    %c0_10 = arith.constant 0 : index
    %11 = vector.load %arg5[%c0_9, %c0_10] : memref<1x1xf32, #tpu.memory_space<vmem>>, vector<1x1xf32>
    %12 = vector.broadcast %11 : vector<1x1xf32> to vector<8x1xf32>
    %13 = arith.addf %10, %12 : vector<8x1xf32>
    %14 = arith.negf %13 : vector<8x1xf32>
    %15 = math.exp %14 : vector<8x1xf32>
    %cst_11 = arith.constant 1.000000e+00 : f32
    %16 = vector.broadcast %cst_11 : f32 to vector<8x1xf32>
    %17 = arith.addf %16, %15 : vector<8x1xf32>
    %18 = arith.divf %16, %17 : vector<8x1xf32>
    %c0_12 = arith.constant 0 : index
    %c0_13 = arith.constant 0 : index
    %19 = vector.load %arg6[%c0_12, %c0_13] : memref<8x1xf32, #tpu.memory_space<vmem>>, vector<8x1xf32>
    tpu.vector_store %arg6[%c0_12, %c0_13], %18 {strides = array<i32>} : memref<8x1xf32, #tpu.memory_space<vmem>>, vector<8x1xf32>,
    return
  }
  func.func @transform_0(%arg0: i32) -> (i32, i32) {
    %c0_i32 = arith.constant 0 : i32
    %c0_i32_0 = arith.constant 0 : i32
    return %arg0, %c0_i32 : i32, i32
  }
  func.func @transform_1(%arg0: i32) -> (i32, i32) {
    %c0_i32 = arith.constant 0 : i32
    %c0_i32_0 = arith.constant 0 : i32
    %c0_i32_1 = arith.constant 0 : i32
    return %c0_i32, %c0_i32_0 : i32, i32
  }
  func.func @transform_2(%arg0: i32) -> (i32, i32) {
    %c0_i32 = arith.constant 0 : i32
    %c0_i32_0 = arith.constant 0 : i32
    %c0_i32_1 = arith.constant 0 : i32
    return %c0_i32, %c0_i32_0 : i32, i32
  }
  func.func @transform_3(%arg0: i32) -> (i32, i32) {
    %c0_i32 = arith.constant 0 : i32
    %c0_i32_0 = arith.constant 0 : i32
    %c0_i32_1 = arith.constant 0 : i32
    return %c0_i32, %c0_i32_0 : i32, i32
  }
  func.func @transform_4(%arg0: i32) -> (i32, i32) {
    %c0_i32 = arith.constant 0 : i32
    %c0_i32_0 = arith.constant 0 : i32
    %c0_i32_1 = arith.constant 0 : i32
    return %c0_i32, %c0_i32_0 : i32, i32
  }
  func.func @transform_5(%arg0: i32) -> (i32, i32) {
    %c0_i32 = arith.constant 0 : i32
    %c0_i32_0 = arith.constant 0 : i32
    return %arg0, %c0_i32 : i32, i32
  }
}

</mosaic_0001>

<bundles_post_ra>
// kernel: tpu_custom_call.1
= control target key start
LH: loop header
LB: loop body
LE: loop exit
PB: predicated region body
PF: predicated region fallthrough
CT: control target
= control target key end

     0   :  { %s490_s0 = inlined_call_operand.hbm [shape: f32[8,32], index: 0, kind: input, shape index: {}]   ;;  %s491_s1 = inlined_call_operand.hbm [shape: f32[32,64], index: 1, kind: input, shape index: {}]   ;;  %s492_s2 = inlined_call_operand.vmem [shape: f32[1,64], index: 2, kind: input, shape index: {}]   ;;  %s493_s3 = inlined_call_operand.hbm [shape: f32[64,128], index: 3, kind: input, shape index: {}]   ;;  %s494_s4 = inlined_call_operand.<no memory space> [shape: f32[1,1], index: 4, kind: input, shape index: {}]   ;;  %s495_s5 = inlined_call_operand.vmem [shape: f32[8,1], index: 5, kind: output, shape index: {}]  }
   0x1   :  { %v10_v0 = vstv %s494_s4 }
   0x2   :  { %11 = vst [vmem:[#allocation2] sm:$0x1] %v10_v0 }
   0x3   :  { %12 = vsyncpa [#allocation4], 0 }
   0x4   :  { %13 = vsyncpa [#allocation6], 0  ;;  %s401_s20 = smov [#allocation5]   ;;  %s331_s24 = scalar_lea.hbm %s491_s1, 512 }
   0x5   :  { %s29_s21 = sshll.u32 %s401_s20, 4  ;;  %p332_p0 = scmp.ne.s32.totalorder %s491_s1, %s331_s24  ;;  %s30_s21 = int_to_ptr.vmem [resolvable:$true] %s29_s21 }
   0x6   :  { %p335_p1 = scmp.lt.u32.totalorder %s331_s24, %s491_s1 }
   0x8   :  { %p337_p2 = pnand %p335_p1, %p332_p0 }
   0xa   :  { %340 = shalt.err (!%p337_p2)
}
   0xb   :  { %s341_s4 = scalar_lea.vmem %s30_s21, 512  ;;  %p346_p4 = scmp.lt.s32.totalorder %s30_s21, %s30_s21 }
   0xc   :  { %p342_p3 = scmp.ne.s32.totalorder %s30_s21, %s341_s4  ;;  %p347_p5 = scmp.lt.s32.totalorder %s341_s4, %s341_s4 }
   0xe   :  { %p348_p6 = por %p347_p5, %p346_p4 }
  0x10   :  { %p349_p7 = pnand %p348_p6, %p342_p3 }
  0x12   :  { %352 = shalt.err (!%p349_p7)
}
  0x13   :  { %s402_s29 = smov 128   ;;  %s403_s30 = smov 8  }
  0x14   :  { %35 = dma.hbm_to_vmem [thread:$0]  %s491_s1, 512, %s30_s21, [#allocation6], %s402_s29, %s402_s29, %s403_s30  }
  0x15   :  { %s404_s8 = smov [#allocation3]   ;;  %s405_s10 = smov [#allocation7]  }
  0x16   :  { %s20_s9 = sshll.u32 %s404_s8, 4  ;;  %s43_s11 = sshll.u32 %s405_s10, 4  ;;  %s21_s9 = int_to_ptr.vmem [resolvable:$true] %s20_s9  ;;  %s44_s11 = int_to_ptr.vmem [resolvable:$true] %s43_s11 }
  0x17   :  { %s353_s14 = scalar_lea.hbm %s490_s0, 128 }
  0x18   :  { %p354_p8 = scmp.ne.s32.totalorder %s490_s0, %s353_s14  ;;  %p357_p9 = scmp.lt.u32.totalorder %s353_s14, %s490_s0 }
  0x1a   :  { %p359_p10 = pnand %p357_p9, %p354_p8 }
  0x1c   :  { %362 = shalt.err (!%p359_p10)
}
  0x1d   :  { %s363_s1 = scalar_lea.vmem %s21_s9, 128  ;;  %p368_p12 = scmp.lt.s32.totalorder %s21_s9, %s21_s9 }
  0x1e   :  { %p364_p11 = scmp.ne.s32.totalorder %s21_s9, %s363_s1  ;;  %p369_p13 = scmp.lt.s32.totalorder %s363_s1, %s363_s1 }
  0x20   :  { %p370_p0 = por %p369_p13, %p368_p12 }
  0x22   :  { %p371_p1 = pnand %p370_p0, %p364_p11 }
  0x24   :  { %374 = shalt.err (!%p371_p1)
}
  0x25   :  { %23 = dma.hbm_to_vmem [thread:$0]  %s490_s0, 128, %s21_s9, [#allocation4]  }
  0x26   :  { %s375_s23 = scalar_lea.hbm %s493_s3, 1024 }
  0x27   :  { %p376_p2 = scmp.ne.s32.totalorder %s493_s3, %s375_s23  ;;  %p379_p3 = scmp.lt.u32.totalorder %s375_s23, %s493_s3 }
  0x29   :  { %p381_p4 = pnand %p379_p3, %p376_p2 }
  0x2b   :  { %384 = shalt.err (!%p381_p4)
}
  0x2c   :  { %s385_s28 = scalar_lea.vmem %s44_s11, 1024  ;;  %p390_p6 = scmp.lt.s32.totalorder %s44_s11, %s44_s11 }
  0x2d   :  { %p386_p5 = scmp.ne.s32.totalorder %s44_s11, %s385_s28  ;;  %p391_p7 = scmp.lt.s32.totalorder %s385_s28, %s385_s28 }
  0x2f   :  { %p392_p8 = por %p391_p7, %p390_p6 }
  0x31   :  { %p393_p9 = pnand %p392_p8, %p386_p5 }
  0x33   :  { %396 = shalt.err (!%p393_p9)
}
  0x34   :  { %49 = dma.hbm_to_vmem [thread:$0]  %s493_s3, 1024, %s44_s11, [#allocation6], %s402_s29, %s402_s29, %s403_s30  }
  0x35   :  { %397 = dma.done.wait [#allocation4], 128  }
  0x36   :  { %398 = vsyncadd [#allocation4], 4294967168 }
  0x37   :  { %399 = dma.done.wait [#allocation6], 1536  }
  0x38   :  { %400 = vsyncadd [#allocation6], 4294965760  ;;  %v406_v1 = vmov 0.0|0.0   ;;  %vm407_vm0 = vmmov 0   ;;  %v408_v2 = vmov 0.0   ;;  %v62_v3 = vld [vmem:[#allocation5] sm:$0xff] }
  0x39   :  { %301 = vmatprep.subr.bf16.mxu0 %v406_v1  ;;  %279 = vmatprep.mubr.msk.f32.mxu0 %vm407_vm0, %v408_v2  ;;  %v63_v4 = vld [vmem:[#allocation5 + $0x8] sm:$0xff]  ;;  %v64_v5 = vld [vmem:[#allocation5 + $0x10] sm:$0xff]  ;;  %v65_v7 = vld [vmem:[#allocation5 + $0x18] sm:$0xff]  ;;  %vm73_vm1 = vcmask 261120   ;;  %vm156_vm2 = vcmask 523264   ;;  %vm244_vm3 = vcmask 7168  }
  0x3a   :  { %307 = vmatprep.subr.bf16.mxu1 %v406_v1  ;;  %298 = vmatprep.mubr.msk.f32.mxu1 %vm407_vm0, %v408_v2  ;;  %v302_v6 = vpack.c.bf16 %v63_v4, %v62_v3  ;;  %v148_v8 = vld [vmem:[#allocation7] sm:$0xff]  ;;  %v149_v9 = vld [vmem:[#allocation7 + $0x8] sm:$0xff]  ;;  %v150_v10 = vld [vmem:[#allocation7 + $0x10] sm:$0xff]  ;;  %v305_v12 = vpack.c.bf16 %v65_v7, %v64_v5 }
  0x3b   :  { %v151_v11 = vld [vmem:[#allocation7 + $0x18] sm:$0xff]  ;;  %v308_v13 = vpack.c.bf16 %v149_v9, %v148_v8  ;;  %v152_v15 = vld [vmem:[#allocation7 + $0x20] sm:$0xff]  ;;  %v153_v16 = vld [vmem:[#allocation7 + $0x28] sm:$0xff] }
  0x3c   :  { %303 = vmatpush3.bf16.msra.mxu0 %v302_v6  ;;  %v311_v14 = vpack.c.bf16 %v151_v11, %v150_v10  ;;  %v61_v17 = vld [vmem:[#allocation3] sm:$0xff]  ;;  %v314_v18 = vpack.c.bf16 %v153_v16, %v152_v15  ;;  %v154_v19 = vld [vmem:[#allocation7 + $0x30] sm:$0xff] }
  0x3d   :  { %304 = vmatprep.subr.bf16.mxu0 %v406_v1  ;;  %309 = vmatpush3.bf16.msra.mxu1 %v308_v13  ;;  %v155_v20 = vld [vmem:[#allocation7 + $0x38] sm:$0xff]  ;;  %v252_v22 = vld [vmem:[%s492_s2] ss:$0 sm:$0xff] }
  0x3e   :  { %310 = vmatprep.subr.bf16.mxu1 %v406_v1  ;;  %v317_v21 = vpack.c.bf16 %v155_v20, %v154_v19  ;;  %v255_v27 = vld [vmem:[#allocation2] ss:$0 sm:$0xff] }
  0x40   :  { %306 = vmatpush3.bf16.msra.mxu0 %v305_v12 }
  0x41   :  { %312 = vmatpush3.bf16.msra.mxu1 %v311_v14 }
  0x42   :  { %313 = vmatprep.subr.bf16.mxu1 %v406_v1 }
  0x43   :  { %280 = vmatmul.mubr.msk.f32.vlgmr.msra.gmra.mrb[0].mxu0 %vm73_vm1, %v61_v17 }
  0x45   :  { %315 = vmatpush3.bf16.msra.mxu1 %v314_v18 }
  0x46   :  { %316 = vmatprep.subr.bf16.mxu1 %v406_v1 }
  0x49   :  { %318 = vmatpush3.bf16.msra.mxu1 %v317_v21 }
 0x116   :  { %v143_v23 = vpop.f32.mrb[0].mxu0 }
 0x117   :  { %v144_v24 = vadd.f32 %v252_v22, %v143_v23  ;;  %v281_v25 = vpop.f32.mrb[1].mxu0 }
 0x119   :  { %v147_v26 = vmax.f32 %v144_v24, 0.0 }
 0x11b   :  { %299 = vmatmul.mubr.msk.f32.vlgmr.msra.gmra.mrb[0].mxu1 %vm156_vm2, %v147_v26 }
 0x1ee   :  { %v226_v28 = vpop.f32.mrb[0].mxu1 }
 0x1ef   :  { %v237_v29 = vadd.f32 %v255_v27, %v226_v28  ;;  %v300_v30 = vpop.f32.mrb[1].mxu1 }
 0x1f1   :  { %v256_v31 = vmul.f32 -1.442695, %v237_v29 }
 0x1f3   :  { %327 = vpow2.f32 %v256_v31 }
 0x1fd   :  { %v328_v32 = vpop.eup %327 }
 0x1fe   :  { %v241_v33 = vadd.f32 1.0, %v328_v32 }
 0x200   :  { %329 = vrcp.f32 %v241_v33 }
 0x20a   :  { %v330_v34 = vpop.eup %329 }
 0x20b   :  { %245 = vst.msk [vmem:[%s495_s5] sm:$0xff] %vm244_vm3, %v330_v34 }
 0x20c   :  { %250 = vsyncpa [#allocation4], 1 }
 0x20d   :  { %251 = vsyncpa [#allocation6], 1 }

</bundles_post_ra>
